<compile_context>
chip_gen: v7x
topology: tpu7x:2x2x1
jax: 0.10.0
libtpu: 0.0.40
codegen_flags: <defaults>
</compile_context>

<pallas_src>
import jax
import jax.numpy as jnp
from jax.experimental import pallas as pl
from jax.experimental.pallas import tpu as pltpu

_MIB = 1024 * 1024


def _ordinal_loss_kernel(logits_ref, targets_ref, out_ref):
    # Native-dtype DMA; cast to f32 after the load (v5e VPU/EUP have no bf16 math).
    x = logits_ref[...].astype(jnp.float32)            # (TB, C)
    t = targets_ref[...]                               # (TB, 1) int32
    TB, C = x.shape

    # Ones RHS used to offload row-sum reductions to the (otherwise idle) MXU.
    ones_rhs = jnp.ones((C, 128), dtype=jnp.float32)

    # ---- pass 1: stable log-sum-exp (max -> XLU, exp -> EUP, row-sum -> MXU) ----
    m = jnp.max(x, axis=-1, keepdims=True)                                      # (TB, 1)
    e = jnp.exp(x - m)                                                          # (TB, C)
    sum_exp = jnp.dot(e, ones_rhs, preferred_element_type=jnp.float32)[:, :1]   # (TB, 1)
    lse = jnp.log(sum_exp)                                                      # (TB, 1)

    # ---- pass 2: gather x[i, target_i] via one-hot mask, row-sum on the MXU ----
    cls_ids = jax.lax.broadcasted_iota(jnp.int32, (TB, C), 1)                   # (TB, C)
    onehot = cls_ids == t                                                       # (TB, C) bool
    masked = jnp.where(onehot, x, 0.0)                                          # (TB, C)
    x_at_t = jnp.dot(masked, ones_rhs, preferred_element_type=jnp.float32)[:, :1]

    # cross entropy: -log_softmax[target] = (m + lse) - x[target]
    base_loss = (m + lse) - x_at_t                                              # (TB, 1)

    # ---- pass 3: argmax along classes (first-max index == torch tie-break) ----
    cand = jnp.where(x >= m, cls_ids, jnp.int32(C))                             # (TB, C)
    pred = jnp.min(cand, axis=-1, keepdims=True)                                # (TB, 1)

    # ---- ordinal weighting ----
    dist = jnp.abs(pred - t).astype(jnp.float32)                                # (TB, 1)
    # TODO(synk): lane-dense (1, TB) output store (column->row relayout before the store) is a
    # modest few-% store-side win; kept as the known-good (TB, 1) column store here.
    # TODO(synk): optional v7x EUP relief: compute exp in bf16 and let the MXU accumulate the
    # row-sum in f32 (costs ~1e-3 relative error in lse; gate behind an accuracy flag).
    out_ref[...] = (1.0 + dist) * base_loss


def _vmem_physical_bytes():
    """Physical per-core VMEM; drives generation-aware tile sizing."""
    try:
        cap = getattr(pltpu.get_tpu_info(), "vmem_capacity_bytes", None)
        if cap:
            return int(cap)
    except Exception:
        pass
    try:
        kind = jax.devices()[0].device_kind.lower()
    except Exception:
        kind = ""
    if ("v5 lite" in kind) or ("v5e" in kind) or ("v6" in kind):
        return 128 * _MIB            # v5e / v6e physical VMEM
    return 64 * _MIB                 # conservative default (v7x per-TensorCore)


def _pick_block_b(B, C, itemsize, vmem_limit):
    """Largest batch tile that fits the scoped-VMEM budget (lane-padded class dim)."""
    c_pad = max(128, pl.cdiv(C, 128) * 128)        # VMEM tiles pad the lane dim to 128
    # Per-row bytes: 2x double-buffered native-dtype logits tile + ~6 live (TB, C) f32/i32
    # temporaries + the small (TB, 128)-padded MXU-sum / targets / output buffers.
    per_row = c_pad * (2 * itemsize + 6 * 4) + 6 * 128 * 4
    budget = int(vmem_limit * 0.7)                 # headroom for compiler scratch
    tb = max(8, budget // per_row)
    tb = min(tb, 8192)
    tb = (tb // 128) * 128 if tb >= 128 else (tb // 8) * 8
    # Never blow a small batch up to a huge tile.
    b_ceil8 = pl.cdiv(B, 8) * 8
    return max(8, min(tb, b_ceil8))


def ordinal_loss(logits, targets, num_classes=None, block_b=None):
    """logits: (B, C) float (any float dtype), targets: (B,) int -> (B,) float32 per-sample loss."""
    B, C = logits.shape
    if num_classes is not None:
        assert C == num_classes
    itemsize = jnp.dtype(logits.dtype).itemsize

    vmem_phys = _vmem_physical_bytes()
    vmem_limit = (vmem_phys * 3) // 4              # explicit scoped-VMEM limit per generation
    if block_b is None:
        block_b = _pick_block_b(B, C, itemsize, vmem_limit)
    n_blocks = pl.cdiv(B, block_b)

    # Tiny per-row metadata only; the big logits array is never padded or re-streamed.
    targets_i32 = targets.astype(jnp.int32).reshape(B, 1)

    out = pl.pallas_call(
        _ordinal_loss_kernel,
        out_shape=jax.ShapeDtypeStruct((B, 1), jnp.float32),
        grid=(n_blocks,),
        in_specs=[
            pl.BlockSpec((block_b, C), lambda i: (i, 0)),
            pl.BlockSpec((block_b, 1), lambda i: (i, 0)),
        ],
        out_specs=pl.BlockSpec((block_b, 1), lambda i: (i, 0)),
        compiler_params=pltpu.CompilerParams(
            # TODO(synk): if an xprof profile shows one v7x TensorCore idle, switch to
            # pltpu.CORE_PARALLEL (or pl.core_map over create_tensorcore_mesh) for explicit
            # 2-TC sharding of the batch axis.
            dimension_semantics=("parallel",),
            vmem_limit_bytes=int(vmem_limit),
        ),
        cost_estimate=pl.CostEstimate(
            flops=int(2 * 2 * B * C * 128 + 8 * B * C),   # two MXU row-sum dots + elementwise
            transcendentals=int(B * C),
            bytes_accessed=int(B * C * itemsize + 2 * B * 4),
        ),
    )(logits, targets_i32)
    return out[:, 0]


def ordinal_loss_ref(logits, targets):
    # Pure-JAX reference replicating the PyTorch module semantics.
    logsm = jax.nn.log_softmax(logits.astype(jnp.float32), axis=1)
    base = -jnp.take_along_axis(logsm, targets[:, None], axis=1)[:, 0]
    pred = jnp.argmax(logits, axis=1)
    dist = jnp.abs(pred - targets).astype(jnp.float32)
    return (1.0 + dist) * base


if __name__ == "__main__":
    num_classes = 10
    batch = 8

    key = jax.random.PRNGKey(0)
    k_logits, k_tgt = jax.random.split(key)
    logits = jax.random.normal(k_logits, (batch, num_classes), dtype=jnp.float32)
    targets = jax.random.randint(k_tgt, (batch,), 0, num_classes, dtype=jnp.int32)

    out = ordinal_loss(logits, targets, num_classes)
    jax.block_until_ready(out)

    ref = ordinal_loss_ref(logits, targets)
    assert out.shape == (batch,)
    assert jnp.allclose(out, ref, rtol=1e-5, atol=1e-5), (out, ref)

    print("KERNEL_OK")
</pallas_src>

<mosaic_0001>
module attributes {stable_mosaic.version = 11 : i64} {
  func.func @_ordinal_loss_kernel(%arg0: i32, %arg1: memref<8x10xf32, #tpu.memory_space<vmem>>, %arg2: memref<8x1xi32, #tpu.memory_space<vmem>>, %arg3: memref<8x1xf32, #tpu.memory_space<vmem>>) attributes {dimension_semantics = [#tpu.dimension_semantics<parallel>], iteration_bounds = array<i64: 1>, scalar_prefetch = 0 : i64, scratch_operands = 0 : i64, tpu.core_type = #tpu.core_type<tc>, window_params = [{transform_indices = @transform_0, window_bounds = array<i64: 8, 10>}, {transform_indices = @transform_1, window_bounds = array<i64: 8, 1>}, {transform_indices = @transform_2, window_bounds = array<i64: 8, 1>}]} {
    %c0 = arith.constant 0 : index
    %c0_0 = arith.constant 0 : index
    %0 = vector.load %arg1[%c0, %c0_0] : memref<8x10xf32, #tpu.memory_space<vmem>>, vector<8x10xf32>
    %c0_1 = arith.constant 0 : index
    %c0_2 = arith.constant 0 : index
    %1 = vector.load %arg2[%c0_1, %c0_2] : memref<8x1xi32, #tpu.memory_space<vmem>>, vector<8x1xi32>
    %cst = arith.constant 1.000000e+00 : f32
    %2 = vector.broadcast %cst : f32 to vector<10x128xf32>
    %cst_3 = arith.constant dense<0xFF800000> : vector<8xf32>
    %3 = vector.multi_reduction <maximumf>, %0, %cst_3 [1] : vector<8x10xf32> to vector<8xf32>
    %4 = vector.shape_cast %3 : vector<8xf32> to vector<8x1xf32>
    %5 = vector.broadcast %4 : vector<8x1xf32> to vector<8x10xf32>
    %6 = arith.subf %0, %5 : vector<8x10xf32>
    %7 = math.exp %6 : vector<8x10xf32>
    %cst_4 = arith.constant dense<0.000000e+00> : vector<8x128xf32>
    %8 = tpu.matmul %7, %2, %cst_4 {dimension_numbers = #tpu.dot_dimension_numbers<[1], [0], [0], [1], [0, 0, 1, 1], [], []>} : vector<8x10xf32>, vector<10x128xf32>, vector<8x128xf32> -> vector<8x128xf32>
    %9 = vector.extract_strided_slice %8 {offsets = [0, 0], sizes = [8, 1], strides = [1, 1]} : vector<8x128xf32> to vector<8x1xf32>
    %10 = math.log %9 : vector<8x1xf32>
    %11 = tpu.iota {dimensions = array<i32: 1>} : vector<8x10xi32>
    %12 = vector.broadcast %1 : vector<8x1xi32> to vector<8x10xi32>
    %13 = arith.cmpi eq, %11, %12 : vector<8x10xi32>
    %cst_5 = arith.constant 0.000000e+00 : f32
    %14 = vector.broadcast %cst_5 : f32 to vector<8x10xf32>
    %15 = arith.select %13, %0, %14 : vector<8x10xi1>, vector<8x10xf32>
    %cst_6 = arith.constant dense<0.000000e+00> : vector<8x128xf32>
    %16 = tpu.matmul %15, %2, %cst_6 {dimension_numbers = #tpu.dot_dimension_numbers<[1], [0], [0], [1], [0, 0, 1, 1], [], []>} : vector<8x10xf32>, vector<10x128xf32>, vector<8x128xf32> -> vector<8x128xf32>
    %17 = vector.extract_strided_slice %16 {offsets = [0, 0], sizes = [8, 1], strides = [1, 1]} : vector<8x128xf32> to vector<8x1xf32>
    %18 = arith.addf %4, %10 : vector<8x1xf32>
    %19 = arith.subf %18, %17 : vector<8x1xf32>
    %20 = vector.broadcast %4 : vector<8x1xf32> to vector<8x10xf32>
    %21 = arith.cmpf oge, %0, %20 : vector<8x10xf32>
    %c10_i32 = arith.constant 10 : i32
    %22 = vector.broadcast %c10_i32 : i32 to vector<8x10xi32>
    %23 = arith.select %21, %11, %22 : vector<8x10xi1>, vector<8x10xi32>
    %cst_7 = arith.constant dense<2147483647> : vector<8xi32>
    %24 = vector.multi_reduction <minsi>, %23, %cst_7 [1] : vector<8x10xi32> to vector<8xi32>
    %25 = vector.shape_cast %24 : vector<8xi32> to vector<8x1xi32>
    %26 = arith.subi %25, %1 : vector<8x1xi32>
    %27 = math.absi %26 : vector<8x1xi32>
    %28 = arith.sitofp %27 : vector<8x1xi32> to vector<8x1xf32>
    %cst_8 = arith.constant 1.000000e+00 : f32
    %29 = vector.broadcast %cst_8 : f32 to vector<8x1xf32>
    %30 = arith.addf %29, %28 : vector<8x1xf32>
    %31 = arith.mulf %30, %19 : vector<8x1xf32>
    %c0_9 = arith.constant 0 : index
    %c0_10 = arith.constant 0 : index
    %32 = vector.load %arg3[%c0_9, %c0_10] : memref<8x1xf32, #tpu.memory_space<vmem>>, vector<8x1xf32>
    tpu.vector_store %arg3[%c0_9, %c0_10], %31 {strides = array<i32>} : memref<8x1xf32, #tpu.memory_space<vmem>>, vector<8x1xf32>,
    return
  }
  func.func @transform_0(%arg0: i32) -> (i32, i32) {
    %c0_i32 = arith.constant 0 : i32
    %c0_i32_0 = arith.constant 0 : i32
    return %arg0, %c0_i32 : i32, i32
  }
  func.func @transform_1(%arg0: i32) -> (i32, i32) {
    %c0_i32 = arith.constant 0 : i32
    %c0_i32_0 = arith.constant 0 : i32
    return %arg0, %c0_i32 : i32, i32
  }
  func.func @transform_2(%arg0: i32) -> (i32, i32) {
    %c0_i32 = arith.constant 0 : i32
    %c0_i32_0 = arith.constant 0 : i32
    return %arg0, %c0_i32 : i32, i32
  }
}

</mosaic_0001>

<bundles_post_ra>
// kernel: tpu_custom_call.1
= control target key start
LH: loop header
LB: loop body
LE: loop exit
PB: predicated region body
PF: predicated region fallthrough
CT: control target
= control target key end

     0   :  { %vm13_vm0 = vcmask 80896   ;;  %v253_v1 = vmov 0   ;;  %vm23_vm1 = vcmask 1041408   ;;  %v254_v4 = vmov 0.0|0.0   ;;  %s287_s0 = inlined_call_operand.vmem [shape: f32[8,10], index: 0, kind: input, shape index: {}]   ;;  %s288_s1 = inlined_call_operand.vmem [shape: s32[8,1], index: 1, kind: input, shape index: {}]   ;;  %s289_s2 = inlined_call_operand.vmem [shape: f32[8,1], index: 2, kind: output, shape index: {}]  }
   0x1   :  { %v11_v0 = vld [vmem:[%s287_s0] sm:$0xff]  ;;  %248 = vset.pattern.permute.xlu0 %v253_v1  ;;  %236 = vmatprep.subr.bf16.mxu0 %v254_v4  ;;  %vm255_vm2 = vmmov 1   ;;  %v256_v5 = vmov 1.0|1.0   ;;  %vm257_vm4 = vmmov 0   ;;  %v258_v6 = vmov 0.0  }
   0x2   :  { %v14_v2 = vsel %vm13_vm0, %v11_v0, -inf  ;;  %v12_v3 = vld [vmem:[%s288_s1] sm:$0xff]  ;;  %vm237_vm3 = vmpackc.low %vm23_vm1, %vm255_vm2  ;;  %226 = vmatprep.mubr.msk.f32.mxu0 %vm257_vm4, %v258_v6  ;;  %239 = vmatprep.subr.bf16.mxu1 %v254_v4  ;;  %v99_v7 = vlaneseq  ;;  %vm205_vm8 = vcmask 7168  }
   0x3   :  { %15 = vmax.xlane.f32.xlu0 %v14_v2  ;;  %238 = vmatpush3.bf16.msk.msra.mxu0 %vm237_vm3, %v256_v5 }
   0x4   :  { %233 = vmatprep.mubr.msk.f32.mxu1 %vm257_vm4, %v258_v6  ;;  %241 = vmatpush3.bf16.msk.msra.mxu1 %vm237_vm3, %v256_v5  ;;  %v100_v8 = vand.u32 127, %v99_v7 }
  0x19   :  { %102 = vperm.xlu0 %248, %v12_v3  }
  0x90   :  { %v16_v9 = vpop.xlane.xlu0 %15 }
  0x91   :  { %v17_v10 = vsub.f32 %v11_v0, %v16_v9  ;;  %vm181_vm5 = vcmp.ge.f32.partialorder %v11_v0, %v16_v9 }
  0x92   :  { %v182_v11 = vsel %vm181_vm5, %v100_v8, 10 }
  0x93   :  { %v18_v12 = vmul.f32 1.442695, %v17_v10  ;;  %v183_v13 = vsel %vm13_vm0, %v182_v11, 2147483647 }
  0x94   :  { %v185_v14 = vshra.s32 %v183_v13, 16  ;;  %v184_v19 = vand.u32 65535, %v183_v13 }
  0x95   :  { %249 = vpow2.f32 %v18_v12 }
  0x96   :  { %v187_v15 = vcvt.s32.f32 %v185_v14  ;;  %v186_v21 = vcvt.s32.f32 %v184_v19 }
  0x98   :  { %188 = vmin.xlane.f32.xlu1 %v187_v15  ;;  %v103_v16 = vpop.permute.xlu0 %102 }
  0x99   :  { %vm104_vm6 = vcmp.eq.s32.totalorder %v100_v8, %v103_v16 }
  0x9a   :  { %v105_v17 = vsel %vm104_vm6, %v11_v0, 0.0 }
  0x9b   :  { %234 = vmatmul.mubr.msk.f32.vlgmr.msra.gmra.mrb[0].mxu1 %vm13_vm0, %v105_v17 }
  0x9f   :  { %v250_v18 = vpop.eup %249 }
  0xa0   :  { %227 = vmatmul.mubr.msk.f32.vlgmr.msra.gmra.mrb[0].mxu0 %vm13_vm0, %v250_v18 }
 0x125   :  { %v189_v20 = vpop.xlane.xlu1 %188 }
 0x126   :  { %vm190_vm7 = vcmp.eq.f32.partialorder %v187_v15, %v189_v20  ;;  %v195_v31 = vcvt.f32.s32 %v189_v20 }
 0x127   :  { %v191_v22 = vsel %vm190_vm7, %v186_v21, inf }
 0x128   :  { %192 = vmin.xlane.f32.xlu1 %v191_v22  ;;  %v196_v33 = vshll.u32 %v195_v31, 16 }
 0x16e   :  { %v175_v23 = vpop.f32.mrb[0].mxu1 }
 0x16f   :  { %v235_v24 = vpop.f32.mrb[1].mxu1 }
 0x173   :  { %v93_v25 = vpop.f32.mrb[0].mxu0 }
 0x174   :  { %251 = vlog2.f32 %v93_v25  ;;  %v228_v26 = vpop.f32.mrb[1].mxu0 }
 0x17e   :  { %v252_v27 = vpop.eup %251 }
 0x17f   :  { %v98_v28 = vmul.f32 0.6931472, %v252_v27 }
 0x181   :  { %v179_v29 = vadd.f32 %v98_v28, %v16_v9 }
 0x183   :  { %v180_v30 = vsub.f32 %v179_v29, %v175_v23 }
 0x1b5   :  { %v193_v32 = vpop.xlane.xlu1 %192 }
 0x1b6   :  { %v194_v34 = vcvt.f32.s32 %v193_v32 }
 0x1b8   :  { %v197_v35 = vadd.s32 %v196_v33, %v194_v34 }
 0x1ba   :  { %v198_v36 = vsub.s32 %v197_v35, %v12_v3 }
 0x1bc   :  { %v200_v37 = vsub.s32 0, %v198_v36 }
 0x1be   :  { %v215_v38 = vmin.u32 %v200_v37, %v198_v36 }
 0x1c0   :  { %v202_v39 = vcvt.s32.f32 %v215_v38 }
 0x1c2   :  { %v203_v40 = vadd.f32 1.0, %v202_v39 }
 0x1c4   :  { %v204_v41 = vmul.f32 %v203_v40, %v180_v30 }
 0x1c6   :  { %206 = vst.msk [vmem:[%s289_s2] sm:$0xff] %vm205_vm8, %v204_v41 }

</bundles_post_ra>
